<compile_context>
chip_gen: v7x
topology: tpu7x:2x2x1
jax: 0.10.0
libtpu: 0.0.40
codegen_flags: <defaults>
</compile_context>

<pallas_src>
import functools

import jax
import jax.numpy as jnp
from jax.experimental import pallas as pl
from jax.experimental.pallas import tpu as pltpu

_BN_EPS = 1e-5


# ------------------------------ Pallas kernel ------------------------------- #

def _fused_basic_block2_kernel(x_ref, u1_ref, u2_ref, b1_ref, b2_ref,
                               out_ref, p_ref):
    """Fused conv3x3+BN1+ReLU -> conv3x3+BN2+residual+ReLU for NB images.

    x_ref   : (NB, H, W*C)        lane-dense input rows; also the residual
    u1_ref  : (3*W*C, W*C) bf16   BN1-scaled, kh-stacked banded conv1 weights
    u2_ref  : (3*W*C, W*C) bf16   BN2-scaled, kh-stacked banded conv2 weights
    b1_ref  : (1, W*C)   f32      BN1 shift (tiled over W)
    b2_ref  : (1, W*C)   f32      BN2 shift (tiled over W)
    out_ref : (NB, H, W*C)
    p_ref   : (NB*(H+2), W*C) f32 VMEM halo buffer shared by both convs
    """
    NB, H, WC = x_ref.shape
    HP = H + 2                 # rows per image inside the halo buffer
    M = NB * HP - 2            # rows produced by each banded matmul

    # Zero ONLY the halo rows (2 per image), every step.  Cheap (2*NB partial
    # row stores) and correct regardless of how a multi-core chip partitions
    # the parallel grid axis over per-core scratch.
    zrow = jnp.zeros((1, WC), jnp.float32)
    for i in range(NB):
        p_ref[i * HP:i * HP + 1, :] = zrow
        p_ref[i * HP + H + 1:i * HP + H + 2, :] = zrow

    # Copy this step's images into the halo buffer (rows i*HP+1 .. i*HP+H).
    for i in range(NB):
        p_ref[i * HP + 1:i * HP + 1 + H, :] = x_ref[i]

    def banded_conv(u_ref):
        # kh folded into K: LHS row r = [P[r] | P[r+1] | P[r+2]], so each conv
        # is ONE (M, 3*WC) @ (3*WC, WC) dot, f32 accumulation on the MXU.
        lhs = jnp.concatenate([p_ref[kh:kh + M, :] for kh in range(3)], axis=1)
        return jnp.dot(lhs.astype(jnp.bfloat16), u_ref[...],
                       preferred_element_type=jnp.float32)

    # ---- conv1 + bn1 + relu; h written back into the SAME halo buffer ------
    # (halo rows are never overwritten, so they stay zero for conv2).
    h = jnp.maximum(banded_conv(u1_ref) + b1_ref[...], 0.0)        # (M, WC) f32
    for i in range(NB):
        p_ref[i * HP + 1:i * HP + 1 + H, :] = h[i * HP:i * HP + H]

    # ---- conv2 + bn2 + residual add + relu ---------------------------------
    y = banded_conv(u2_ref) + b2_ref[...]                           # (M, WC) f32
    for i in range(NB):   # rows between images are junk and simply skipped
        out_ref[i] = jnp.maximum(y[i * HP:i * HP + H] + x_ref[i],
                                 0.0).astype(out_ref.dtype)


# ---------------------------- pallas_call wrapper ---------------------------- #

def _fused_block_call(x_flat, u1s, u2s, b1, b2, nb):
    N, H, WC = x_flat.shape
    grid = N // nb

    # VMEM budget derived from the actual buffers (+2 MiB headroom, >=8 MiB).
    x_blk_bytes = nb * H * WC * 4
    const_bytes = (u1s.size * u1s.dtype.itemsize + u2s.size * u2s.dtype.itemsize
                   + (b1.size + b2.size) * 4)
    scratch_bytes = nb * (H + 2) * WC * 4
    vmem_limit = int(max(2 * 2 * x_blk_bytes + const_bytes + scratch_bytes
                         + (2 << 20), 8 << 20))

    def const_spec(shape):
        # Block index never changes -> single buffer is enough.
        return pl.BlockSpec(shape, lambda n: (0, 0),
                            pipeline_mode=pl.Buffered(1))

    return pl.pallas_call(
        _fused_basic_block2_kernel,
        out_shape=jax.ShapeDtypeStruct((N, H, WC), jnp.float32),
        grid=(grid,),
        in_specs=[
            pl.BlockSpec((nb, H, WC), lambda n: (n, 0, 0)),   # x / residual
            const_spec(u1s.shape),                            # U1 (kh-stacked, bf16)
            const_spec(u2s.shape),                            # U2 (kh-stacked, bf16)
            const_spec(b1.shape),                             # b1 shift
            const_spec(b2.shape),                             # b2 shift
        ],
        out_specs=pl.BlockSpec((nb, H, WC), lambda n: (n, 0, 0)),
        scratch_shapes=[
            pltpu.VMEM((nb * (H + 2), WC), jnp.float32),      # shared halo buffer
        ],
        compiler_params=pltpu.CompilerParams(
            dimension_semantics=("parallel",),
            vmem_limit_bytes=vmem_limit,
        ),
    )(x_flat, u1s, u2s, b1, b2)


# --------------------------- weight / BN preparation ------------------------- #

def _bn_fold(bn, d_id):
    g = bn["gamma"][d_id]
    b = bn["beta"][d_id]
    m = bn["mean"][d_id]
    v = bn["var"][d_id]
    scale = g * jax.lax.rsqrt(v + _BN_EPS)
    shift = b - m * scale
    return scale, shift


def _unroll_conv3x3(w, width):
    """(3,3,Cin,Cout) conv weights -> (3, W*Cin, W*Cout) banded matmul weights.

    U[kh, x_in*Cin+ci, x_out*Cout+co] = w[kh, x_in-x_out+1, ci, co] (zero where
    the kw tap falls outside the image), so a SAME-padded 3x3 conv of a
    row-flattened image becomes   out[h] = sum_kh xrows[h+kh] @ U[kh].
    """
    KH, KW, Cin, Cout = w.shape
    x_in = jnp.arange(width)[:, None]
    x_out = jnp.arange(width)[None, :]
    kw_idx = x_in - x_out + 1                                   # (W, W)
    valid = (kw_idx >= 0) & (kw_idx < KW)
    wk = w[:, jnp.clip(kw_idx, 0, KW - 1)]                      # (KH, W, W, Cin, Cout)
    wk = jnp.where(valid[None, :, :, None, None], wk, 0.0)
    u = jnp.transpose(wk, (0, 1, 3, 2, 4))                      # (KH, W, Cin, W, Cout)
    return u.reshape(KH, width * Cin, width * Cout)


def prepare_block_constants(params, d_id, width):
    """Fold eval-mode domain-BN + kw taps into kh-stacked banded weights.

    In a full network this runs ONCE per (params, d_id) and is cached; it must
    not sit on the per-call hot path next to the kernel.
    """
    s1, b1 = _bn_fold(params["bn1"], d_id)
    s2, b2 = _bn_fold(params["bn2"], d_id)
    u1 = _unroll_conv3x3(params["w1"], width) * jnp.tile(s1, width)[None, None, :]
    u2 = _unroll_conv3x3(params["w2"], width) * jnp.tile(s2, width)[None, None, :]
    u1s = u1.reshape(u1.shape[0] * u1.shape[1], u1.shape[2]).astype(jnp.bfloat16)
    u2s = u2.reshape(u2.shape[0] * u2.shape[1], u2.shape[2]).astype(jnp.bfloat16)
    return dict(u1=u1s, u2=u2s,
                b1=jnp.tile(b1, width)[None, :].astype(jnp.float32),
                b2=jnp.tile(b2, width)[None, :].astype(jnp.float32))


def basic_block2_apply(consts, x_flat, images_per_step=2):
    """Run the fused block on lane-dense (N, H, W*C) activations."""
    N = x_flat.shape[0]
    nb = images_per_step
    # Keep >=2 grid steps when possible so v7x megacore gets parallel work.
    while nb > 1 and (N % nb != 0 or N // nb < 2):
        nb -= 1
    return _fused_block_call(x_flat, consts["u1"], consts["u2"],
                             consts["b1"], consts["b2"], nb)


# ------------------------------- Forward pass -------------------------------- #

def basic_block2_forward(params, x_nchw, d_tensor):
    """Equivalent of BasicBlock2.forward([x, d_tensor]) (stride=1, downsample=None).

    NCHW interface for parity with the PyTorch module.  In a full network keep
    the lane-dense (N, H, W*C) layout across blocks and cache
    prepare_block_constants per d_id instead of redoing both every call.
    """
    d_id = d_tensor[0]
    N, C, H, W = x_nchw.shape
    x_flat = jnp.transpose(x_nchw, (0, 2, 3, 1)).reshape(N, H, W * C)
    consts = prepare_block_constants(params, d_id, W)
    out_flat = basic_block2_apply(consts, x_flat)
    out_nchw = jnp.transpose(out_flat.reshape(N, H, W, C), (0, 3, 1, 2))
    return out_nchw, d_id


# ----------------------- Pure-JAX reference (for checking) ------------------- #

def _reference_forward(params, x_nchw, d_tensor):
    d_id = d_tensor[0]
    x = jnp.transpose(x_nchw, (0, 2, 3, 1))
    conv = lambda inp, w: jax.lax.conv_general_dilated(
        inp, w, (1, 1), "SAME", dimension_numbers=("NHWC", "HWIO", "NHWC"))
    s1, b1 = _bn_fold(params["bn1"], d_id)
    s2, b2 = _bn_fold(params["bn2"], d_id)
    h = jnp.maximum(conv(x, params["w1"]) * s1 + b1, 0.0)
    o = conv(h, params["w2"]) * s2 + b2
    o = jnp.maximum(o + x, 0.0)
    return jnp.transpose(o, (0, 3, 1, 2)), d_id


# ------------------------------ Parameter init ------------------------------- #

def init_params(key, inplanes, planes, num_domains):
    ks = jax.random.split(key, 10)
    w1 = jax.random.normal(ks[0], (3, 3, inplanes, planes), jnp.float32) \
        * (2.0 / (inplanes * 9)) ** 0.5
    w2 = jax.random.normal(ks[1], (3, 3, planes, planes), jnp.float32) \
        * (2.0 / (planes * 9)) ** 0.5

    def bn_params(k_g, k_b, k_m, k_v):
        return dict(
            gamma=1.0 + 0.1 * jax.random.normal(k_g, (num_domains, planes), jnp.float32),
            beta=0.1 * jax.random.normal(k_b, (num_domains, planes), jnp.float32),
            mean=0.05 * jax.random.normal(k_m, (num_domains, planes), jnp.float32),
            var=0.9 + 0.2 * jax.random.uniform(k_v, (num_domains, planes), jnp.float32),
        )

    return dict(
        w1=w1,
        w2=w2,
        bn1=bn_params(ks[2], ks[3], ks[4], ks[5]),
        bn2=bn_params(ks[6], ks[7], ks[8], ks[9]),
    )


# ----------------------------------- Main ------------------------------------ #

if __name__ == "__main__":
    key = jax.random.PRNGKey(0)
    k_x, k_p = jax.random.split(key)

    # inplanes == planes (residual add requires it); W*C = 16*8 = 128 lanes.
    # N=4 so that with 2 images per grid step the grid still has 2 parallel steps.
    N, C, H, W = 4, 8, 16, 16
    NUM_DOMAINS = 3

    x = jax.random.normal(k_x, (N, C, H, W), jnp.float32)
    d_tensor = jnp.array([1, 1], dtype=jnp.int32)   # x[1] in the PyTorch module; d_id = x[1][0]
    params = init_params(k_p, C, C, NUM_DOMAINS)

    fwd = jax.jit(functools.partial(basic_block2_forward, params))
    out, d_id = fwd(x, d_tensor)
    out = jax.block_until_ready(out)

    ref_out, _ = _reference_forward(params, x, d_tensor)
    assert out.shape == (N, C, H, W)
    # bf16 matmul operands with f32 accumulation -> ~1e-2-level expected error.
    err = jnp.max(jnp.abs(out - ref_out))
    assert jnp.allclose(out, ref_out, atol=3e-2, rtol=3e-2), \
        f"mismatch vs reference (max abs err {err})"
    assert int(d_id) == 1

    print("KERNEL_OK")
</pallas_src>

<mosaic_0001>
module attributes {stable_mosaic.version = 11 : i64} {
  func.func @_fused_basic_block2_kernel(%arg0: i32, %arg1: memref<2x16x128xf32, #tpu.memory_space<vmem>>, %arg2: memref<384x128xbf16, #tpu.memory_space<vmem>>, %arg3: memref<384x128xbf16, #tpu.memory_space<vmem>>, %arg4: memref<1x128xf32, #tpu.memory_space<vmem>>, %arg5: memref<1x128xf32, #tpu.memory_space<vmem>>, %arg6: memref<2x16x128xf32, #tpu.memory_space<vmem>>, %arg7: memref<36x128xf32, #tpu.memory_space<vmem>>) attributes {dimension_semantics = [#tpu.dimension_semantics<parallel>], iteration_bounds = array<i64: 2>, scalar_prefetch = 0 : i64, scratch_operands = 1 : i64, tpu.core_type = #tpu.core_type<tc>, window_params = [{transform_indices = @transform_0, window_bounds = array<i64: 2, 16, 128>}, {pipeline_mode = #tpu.pipeline_mode<synchronous>, transform_indices = @transform_1, window_bounds = array<i64: 384, 128>}, {pipeline_mode = #tpu.pipeline_mode<synchronous>, transform_indices = @transform_2, window_bounds = array<i64: 384, 128>}, {pipeline_mode = #tpu.pipeline_mode<synchronous>, transform_indices = @transform_3, window_bounds = array<i64: 1, 128>}, {pipeline_mode = #tpu.pipeline_mode<synchronous>, transform_indices = @transform_4, window_bounds = array<i64: 1, 128>}, {transform_indices = @transform_5, window_bounds = array<i64: 2, 16, 128>}]} {
    %cst = arith.constant 0.000000e+00 : f32
    %0 = vector.broadcast %cst : f32 to vector<1x128xf32>
    %c0 = arith.constant 0 : index
    %c0_0 = arith.constant 0 : index
    %1 = vector.load %arg7[%c0, %c0_0] : memref<36x128xf32, #tpu.memory_space<vmem>>, vector<1x128xf32>
    tpu.vector_store %arg7[%c0, %c0_0], %0 {strides = array<i32>} : memref<36x128xf32, #tpu.memory_space<vmem>>, vector<1x128xf32>,
    %c17 = arith.constant 17 : index
    %c0_1 = arith.constant 0 : index
    %2 = vector.load %arg7[%c17, %c0_1] : memref<36x128xf32, #tpu.memory_space<vmem>>, vector<1x128xf32>
    tpu.vector_store %arg7[%c17, %c0_1], %0 {strides = array<i32>} : memref<36x128xf32, #tpu.memory_space<vmem>>, vector<1x128xf32>,
    %c18 = arith.constant 18 : index
    %c0_2 = arith.constant 0 : index
    %3 = vector.load %arg7[%c18, %c0_2] : memref<36x128xf32, #tpu.memory_space<vmem>>, vector<1x128xf32>
    tpu.vector_store %arg7[%c18, %c0_2], %0 {strides = array<i32>} : memref<36x128xf32, #tpu.memory_space<vmem>>, vector<1x128xf32>,
    %c35 = arith.constant 35 : index
    %c0_3 = arith.constant 0 : index
    %4 = vector.load %arg7[%c35, %c0_3] : memref<36x128xf32, #tpu.memory_space<vmem>>, vector<1x128xf32>
    tpu.vector_store %arg7[%c35, %c0_3], %0 {strides = array<i32>} : memref<36x128xf32, #tpu.memory_space<vmem>>, vector<1x128xf32>,
    %c0_4 = arith.constant 0 : index
    %c0_5 = arith.constant 0 : index
    %c0_6 = arith.constant 0 : index
    %5 = vector.load %arg1[%c0_4, %c0_5, %c0_6] : memref<2x16x128xf32, #tpu.memory_space<vmem>>, vector<1x16x128xf32>
    %6 = vector.shape_cast %5 : vector<1x16x128xf32> to vector<16x128xf32>
    %c1 = arith.constant 1 : index
    %c0_7 = arith.constant 0 : index
    %7 = vector.load %arg7[%c1, %c0_7] : memref<36x128xf32, #tpu.memory_space<vmem>>, vector<16x128xf32>
    tpu.vector_store %arg7[%c1, %c0_7], %6 {strides = array<i32>} : memref<36x128xf32, #tpu.memory_space<vmem>>, vector<16x128xf32>,
    %c1_8 = arith.constant 1 : index
    %c0_9 = arith.constant 0 : index
    %c0_10 = arith.constant 0 : index
    %8 = vector.load %arg1[%c1_8, %c0_9, %c0_10] : memref<2x16x128xf32, #tpu.memory_space<vmem>>, vector<1x16x128xf32>
    %9 = vector.shape_cast %8 : vector<1x16x128xf32> to vector<16x128xf32>
    %c19 = arith.constant 19 : index
    %c0_11 = arith.constant 0 : index
    %10 = vector.load %arg7[%c19, %c0_11] : memref<36x128xf32, #tpu.memory_space<vmem>>, vector<16x128xf32>
    tpu.vector_store %arg7[%c19, %c0_11], %9 {strides = array<i32>} : memref<36x128xf32, #tpu.memory_space<vmem>>, vector<16x128xf32>,
    %c0_12 = arith.constant 0 : index
    %c0_13 = arith.constant 0 : index
    %11 = vector.load %arg7[%c0_12, %c0_13] : memref<36x128xf32, #tpu.memory_space<vmem>>, vector<34x128xf32>
    %c1_14 = arith.constant 1 : index
    %c0_15 = arith.constant 0 : index
    %12 = vector.load %arg7[%c1_14, %c0_15] : memref<36x128xf32, #tpu.memory_space<vmem>>, vector<34x128xf32>
    %c2 = arith.constant 2 : index
    %c0_16 = arith.constant 0 : index
    %13 = vector.load %arg7[%c2, %c0_16] : memref<36x128xf32, #tpu.memory_space<vmem>>, vector<34x128xf32>
    %14 = tpu.concatenate %11, %12, %13 in 1 : vector<34x128xf32>, vector<34x128xf32>, vector<34x128xf32> -> vector<34x384xf32>
    %15 = arith.truncf %14 : vector<34x384xf32> to vector<34x384xbf16>
    %c0_17 = arith.constant 0 : index
    %c0_18 = arith.constant 0 : index
    %16 = vector.load %arg2[%c0_17, %c0_18] : memref<384x128xbf16, #tpu.memory_space<vmem>>, vector<384x128xbf16>
    %cst_19 = arith.constant dense<0.000000e+00> : vector<34x128xf32>
    %17 = tpu.matmul %15, %16, %cst_19 {dimension_numbers = #tpu.dot_dimension_numbers<[1], [0], [0], [1], [0, 0, 1, 1], [], []>} : vector<34x384xbf16>, vector<384x128xbf16>, vector<34x128xf32> -> vector<34x128xf32>
    %c0_20 = arith.constant 0 : index
    %c0_21 = arith.constant 0 : index
    %18 = vector.load %arg4[%c0_20, %c0_21] : memref<1x128xf32, #tpu.memory_space<vmem>>, vector<1x128xf32>
    %19 = vector.broadcast %18 : vector<1x128xf32> to vector<34x128xf32>
    %20 = arith.addf %17, %19 : vector<34x128xf32>
    %cst_22 = arith.constant 0.000000e+00 : f32
    %21 = vector.broadcast %cst_22 : f32 to vector<34x128xf32>
    %22 = arith.maximumf %20, %21 : vector<34x128xf32>
    %23 = vector.extract_strided_slice %22 {offsets = [0, 0], sizes = [16, 128], strides = [1, 1]} : vector<34x128xf32> to vector<16x128xf32>
    %c1_23 = arith.constant 1 : index
    %c0_24 = arith.constant 0 : index
    %24 = vector.load %arg7[%c1_23, %c0_24] : memref<36x128xf32, #tpu.memory_space<vmem>>, vector<16x128xf32>
    tpu.vector_store %arg7[%c1_23, %c0_24], %23 {strides = array<i32>} : memref<36x128xf32, #tpu.memory_space<vmem>>, vector<16x128xf32>,
    %25 = vector.extract_strided_slice %22 {offsets = [18, 0], sizes = [16, 128], strides = [1, 1]} : vector<34x128xf32> to vector<16x128xf32>
    %c19_25 = arith.constant 19 : index
    %c0_26 = arith.constant 0 : index
    %26 = vector.load %arg7[%c19_25, %c0_26] : memref<36x128xf32, #tpu.memory_space<vmem>>, vector<16x128xf32>
    tpu.vector_store %arg7[%c19_25, %c0_26], %25 {strides = array<i32>} : memref<36x128xf32, #tpu.memory_space<vmem>>, vector<16x128xf32>,
    %c0_27 = arith.constant 0 : index
    %c0_28 = arith.constant 0 : index
    %27 = vector.load %arg7[%c0_27, %c0_28] : memref<36x128xf32, #tpu.memory_space<vmem>>, vector<34x128xf32>
    %c1_29 = arith.constant 1 : index
    %c0_30 = arith.constant 0 : index
    %28 = vector.load %arg7[%c1_29, %c0_30] : memref<36x128xf32, #tpu.memory_space<vmem>>, vector<34x128xf32>
    %c2_31 = arith.constant 2 : index
    %c0_32 = arith.constant 0 : index
    %29 = vector.load %arg7[%c2_31, %c0_32] : memref<36x128xf32, #tpu.memory_space<vmem>>, vector<34x128xf32>
    %30 = tpu.concatenate %27, %28, %29 in 1 : vector<34x128xf32>, vector<34x128xf32>, vector<34x128xf32> -> vector<34x384xf32>
    %31 = arith.truncf %30 : vector<34x384xf32> to vector<34x384xbf16>
    %c0_33 = arith.constant 0 : index
    %c0_34 = arith.constant 0 : index
    %32 = vector.load %arg3[%c0_33, %c0_34] : memref<384x128xbf16, #tpu.memory_space<vmem>>, vector<384x128xbf16>
    %cst_35 = arith.constant dense<0.000000e+00> : vector<34x128xf32>
    %33 = tpu.matmul %31, %32, %cst_35 {dimension_numbers = #tpu.dot_dimension_numbers<[1], [0], [0], [1], [0, 0, 1, 1], [], []>} : vector<34x384xbf16>, vector<384x128xbf16>, vector<34x128xf32> -> vector<34x128xf32>
    %c0_36 = arith.constant 0 : index
    %c0_37 = arith.constant 0 : index
    %34 = vector.load %arg5[%c0_36, %c0_37] : memref<1x128xf32, #tpu.memory_space<vmem>>, vector<1x128xf32>
    %35 = vector.broadcast %34 : vector<1x128xf32> to vector<34x128xf32>
    %36 = arith.addf %33, %35 : vector<34x128xf32>
    %37 = vector.extract_strided_slice %36 {offsets = [0, 0], sizes = [16, 128], strides = [1, 1]} : vector<34x128xf32> to vector<16x128xf32>
    %c0_38 = arith.constant 0 : index
    %c0_39 = arith.constant 0 : index
    %c0_40 = arith.constant 0 : index
    %38 = vector.load %arg1[%c0_38, %c0_39, %c0_40] : memref<2x16x128xf32, #tpu.memory_space<vmem>>, vector<1x16x128xf32>
    %39 = vector.shape_cast %38 : vector<1x16x128xf32> to vector<16x128xf32>
    %40 = arith.addf %37, %39 : vector<16x128xf32>
    %cst_41 = arith.constant 0.000000e+00 : f32
    %41 = vector.broadcast %cst_41 : f32 to vector<16x128xf32>
    %42 = arith.maximumf %40, %41 : vector<16x128xf32>
    %c0_42 = arith.constant 0 : index
    %c0_43 = arith.constant 0 : index
    %c0_44 = arith.constant 0 : index
    %43 = vector.load %arg6[%c0_42, %c0_43, %c0_44] : memref<2x16x128xf32, #tpu.memory_space<vmem>>, vector<1x16x128xf32>
    %44 = vector.shape_cast %43 : vector<1x16x128xf32> to vector<16x128xf32>
    %45 = vector.shape_cast %42 : vector<16x128xf32> to vector<1x16x128xf32>
    tpu.vector_store %arg6[%c0_42, %c0_43, %c0_44], %45 {strides = array<i32>} : memref<2x16x128xf32, #tpu.memory_space<vmem>>, vector<1x16x128xf32>,
    %46 = vector.extract_strided_slice %36 {offsets = [18, 0], sizes = [16, 128], strides = [1, 1]} : vector<34x128xf32> to vector<16x128xf32>
    %c1_45 = arith.constant 1 : index
    %c0_46 = arith.constant 0 : index
    %c0_47 = arith.constant 0 : index
    %47 = vector.load %arg1[%c1_45, %c0_46, %c0_47] : memref<2x16x128xf32, #tpu.memory_space<vmem>>, vector<1x16x128xf32>
    %48 = vector.shape_cast %47 : vector<1x16x128xf32> to vector<16x128xf32>
    %49 = arith.addf %46, %48 : vector<16x128xf32>
    %cst_48 = arith.constant 0.000000e+00 : f32
    %50 = vector.broadcast %cst_48 : f32 to vector<16x128xf32>
    %51 = arith.maximumf %49, %50 : vector<16x128xf32>
    %c1_49 = arith.constant 1 : index
    %c0_50 = arith.constant 0 : index
    %c0_51 = arith.constant 0 : index
    %52 = vector.load %arg6[%c1_49, %c0_50, %c0_51] : memref<2x16x128xf32, #tpu.memory_space<vmem>>, vector<1x16x128xf32>
    %53 = vector.shape_cast %52 : vector<1x16x128xf32> to vector<16x128xf32>
    %54 = vector.shape_cast %51 : vector<16x128xf32> to vector<1x16x128xf32>
    tpu.vector_store %arg6[%c1_49, %c0_50, %c0_51], %54 {strides = array<i32>} : memref<2x16x128xf32, #tpu.memory_space<vmem>>, vector<1x16x128xf32>,
    return
  }
  func.func @transform_0(%arg0: i32) -> (i32, i32, i32) {
    %c0_i32 = arith.constant 0 : i32
    %c0_i32_0 = arith.constant 0 : i32
    %c0_i32_1 = arith.constant 0 : i32
    return %arg0, %c0_i32, %c0_i32_0 : i32, i32, i32
  }
  func.func @transform_1(%arg0: i32) -> (i32, i32) {
    %c0_i32 = arith.constant 0 : i32
    %c0_i32_0 = arith.constant 0 : i32
    %c0_i32_1 = arith.constant 0 : i32
    return %c0_i32, %c0_i32_0 : i32, i32
  }
  func.func @transform_2(%arg0: i32) -> (i32, i32) {
    %c0_i32 = arith.constant 0 : i32
    %c0_i32_0 = arith.constant 0 : i32
    %c0_i32_1 = arith.constant 0 : i32
    return %c0_i32, %c0_i32_0 : i32, i32
  }
  func.func @transform_3(%arg0: i32) -> (i32, i32) {
    %c0_i32 = arith.constant 0 : i32
    %c0_i32_0 = arith.constant 0 : i32
    %c0_i32_1 = arith.constant 0 : i32
    return %c0_i32, %c0_i32_0 : i32, i32
  }
  func.func @transform_4(%arg0: i32) -> (i32, i32) {
    %c0_i32 = arith.constant 0 : i32
    %c0_i32_0 = arith.constant 0 : i32
    %c0_i32_1 = arith.constant 0 : i32
    return %c0_i32, %c0_i32_0 : i32, i32
  }
  func.func @transform_5(%arg0: i32) -> (i32, i32, i32) {
    %c0_i32 = arith.constant 0 : i32
    %c0_i32_0 = arith.constant 0 : i32
    %c0_i32_1 = arith.constant 0 : i32
    return %arg0, %c0_i32, %c0_i32_0 : i32, i32, i32
  }
}

</mosaic_0001>

<bundles_post_ra>
// kernel: tile.28
= control target key start
LH: loop header
LB: loop body
LE: loop exit
PB: predicated region body
PF: predicated region fallthrough
CT: control target
= control target key end

     0   :  { %s28_s0 = inlined_call_operand.vmem [shape: f32[8], index: 0, kind: input, shape index: {}]   ;;  %s29_s1 = inlined_call_operand.vmem [shape: f32[16,8], index: 1, kind: output, shape index: {}]  }
   0x1   :  { %v4_v0 = vld [vmem:[%s28_s0] ss:$0 sm:$0xff] }
   0x2   :  { %5 = vst [vmem:[%s29_s1] sm:$0xff] %v4_v0  ;;  %8 = vst [vmem:[%s29_s1 + $0x8] sm:$0xff] %v4_v0 }

// kernel: mul.21
= control target key start
LH: loop header
LB: loop body
LE: loop exit
PB: predicated region body
PF: predicated region fallthrough
CT: control target
= control target key end

     0   :  { %s131_s10 = smov 120   ;;  %s132_s11 = smov 104   ;;  %vm3_vm0 = vcmask 64512   ;;  %vm9_vm1 = vcmask 1048512   ;;  %vm15_vm2 = vcmask 982912   ;;  %vm21_vm3 = vcmask 917312   ;;  %s207_s0 = inlined_call_operand.vmem [shape: f32[16,8], index: 0, kind: input, shape index: {}]   ;;  %s208_s1 = inlined_call_operand.vmem [shape: f32[128], index: 1, kind: output, shape index: {}]  }
   0x1   :  { %v101_v0 = vld [vmem:[%s207_s0 + $0xf] sm:$0x1]   ;;  %v103_v1 = vld [vmem:[%s207_s0 + $0xd] sm:$0x1]   ;;  %v102_v2 = vld [vmem:[%s207_s0 + $0xe] sm:$0x1]  }
   0x2   :  { %7 = vrot.lane.b32.xlu0 %v101_v0, %s131_s10  ;;  %19 = vrot.lane.b32.xlu1 %v103_v1, %s132_s11  ;;  %v104_v3 = vld [vmem:[%s207_s0 + $0xc] sm:$0x1]   ;;  %s133_s16 = smov 112   ;;  %s134_s17 = smov 96   ;;  %v105_v4 = vld [vmem:[%s207_s0 + $0xb] sm:$0x1]  }
   0x3   :  { %v106_v5 = vld [vmem:[%s207_s0 + $0xa] sm:$0x1]   ;;  %v2_v6 = vld [vmem:[%s207_s0] sm:$0x1]   ;;  %s135_s24 = smov 88   ;;  %s136_s25 = smov 80  }
   0x4   :  { %4 = vst.msk [vmem:[#allocation0] sm:$0x1] %vm3_vm0, %v2_v6   ;;  %v107_v7 = vld [vmem:[%s207_s0 + $0x9] sm:$0x1]   ;;  %v108_v8 = vld [vmem:[%s207_s0 + $0x8] sm:$0x1]  }
   0x5   :  { %s137_s30 = smov 72   ;;  %s138_s2 = smov 64   ;;  %v109_v9 = vld [vmem:[%s207_s0 + $0x7] sm:$0x1]   ;;  %v110_v10 = vld [vmem:[%s207_s0 + $0x6] sm:$0x1]  }
   0x6   :  { %13 = vrot.lane.b32.xlu0 %v102_v2, %s133_s16  ;;  %25 = vrot.lane.b32.xlu1 %v104_v3, %s134_s17  ;;  %s139_s7 = smov 56   ;;  %s140_s8 = smov 48   ;;  %v111_v11 = vld [vmem:[%s207_s0 + $0x5] sm:$0x1]   ;;  %v112_v12 = vld [vmem:[%s207_s0 + $0x4] sm:$0x1]  }
   0x7   :  { %s141_s13 = smov 40   ;;  %s142_s14 = smov 32   ;;  %v113_v13 = vld [vmem:[%s207_s0 + $0x3] sm:$0x1]   ;;  %v114_v14 = vld [vmem:[%s207_s0 + $0x2] sm:$0x1]  }
   0x8   :  { %s143_s19 = smov 24   ;;  %s144_s20 = smov 16   ;;  %v115_v15 = vld [vmem:[%s207_s0 + $0x1] sm:$0x1]   ;;  %vm27_vm4 = vcmask 851712   ;;  %vm33_vm5 = vcmask 786112  }
   0x9   :  { %s145_s0 = smov 8   ;;  %vm39_vm6 = vcmask 720512   ;;  %vm45_vm7 = vcmask 654912   ;;  %vm51_vm8 = vcmask 589312   ;;  %vm57_vm9 = vcmask 523712  }
   0xa   :  { %31 = vrot.lane.b32.xlu0 %v105_v4, %s135_s24  ;;  %37 = vrot.lane.b32.xlu1 %v106_v5, %s136_s25  ;;  %vm63_vm10 = vcmask 458112   ;;  %vm69_vm11 = vcmask 392512   ;;  %vm75_vm12 = vcmask 326912   ;;  %vm81_vm13 = vcmask 261312  }
   0xb   :  { %vm87_vm14 = vcmask 195712   ;;  %vm93_vm15 = vcmask 130112  }
   0xe   :  { %43 = vrot.lane.b32.xlu0 %v107_v7, %s137_s30  ;;  %49 = vrot.lane.b32.xlu1 %v108_v8, %s138_s2 }
  0x12   :  { %55 = vrot.lane.b32.xlu0 %v109_v9, %s139_s7  ;;  %61 = vrot.lane.b32.xlu1 %v110_v10, %s140_s8 }
  0x16   :  { %67 = vrot.lane.b32.xlu0 %v111_v11, %s141_s13  ;;  %73 = vrot.lane.b32.xlu1 %v112_v12, %s142_s14 }
  0x1a   :  { %79 = vrot.lane.b32.xlu0 %v113_v13, %s143_s19  ;;  %85 = vrot.lane.b32.xlu1 %v114_v14, %s144_s20 }
  0x1e   :  { %91 = vrot.lane.b32.xlu0 %v115_v15, %s145_s0 }
  0x74   :  { %v8_v16 = vpop.permute.xlu0 %7   ;;  %v20_v17 = vpop.permute.xlu1 %19  }
  0x75   :  { %10 = vst.msk [vmem:[#allocation0] sm:$0x1] %vm9_vm1, %v8_v16  }
  0x78   :  { %v14_v18 = vpop.permute.xlu0 %13   ;;  %v26_v19 = vpop.permute.xlu1 %25  }
  0x79   :  { %16 = vst.msk [vmem:[#allocation0] sm:$0x1] %vm15_vm2, %v14_v18  }
  0x7a   :  { %22 = vst.msk [vmem:[#allocation0] sm:$0x1] %vm21_vm3, %v20_v17  }
  0x7b   :  { %28 = vst.msk [vmem:[#allocation0] sm:$0x1] %vm27_vm4, %v26_v19  }
  0x7c   :  { %v32_v20 = vpop.permute.xlu0 %31   ;;  %v38_v21 = vpop.permute.xlu1 %37  }
  0x7d   :  { %34 = vst.msk [vmem:[#allocation0] sm:$0x1] %vm33_vm5, %v32_v20  }
  0x7e   :  { %40 = vst.msk [vmem:[#allocation0] sm:$0x1] %vm39_vm6, %v38_v21  }
  0x80   :  { %v44_v22 = vpop.permute.xlu0 %43   ;;  %v50_v23 = vpop.permute.xlu1 %49  }
  0x81   :  { %46 = vst.msk [vmem:[#allocation0] sm:$0x1] %vm45_vm7, %v44_v22  }
  0x82   :  { %52 = vst.msk [vmem:[#allocation0] sm:$0x1] %vm51_vm8, %v50_v23  }
  0x84   :  { %v56_v24 = vpop.permute.xlu0 %55   ;;  %v62_v25 = vpop.permute.xlu1 %61  }
  0x85   :  { %58 = vst.msk [vmem:[#allocation0] sm:$0x1] %vm57_vm9, %v56_v24  }
  0x86   :  { %64 = vst.msk [vmem:[#allocation0] sm:$0x1] %vm63_vm10, %v62_v25  }
  0x88   :  { %v68_v26 = vpop.permute.xlu0 %67   ;;  %v74_v27 = vpop.permute.xlu1 %73  }
  0x89   :  { %70 = vst.msk [vmem:[#allocation0] sm:$0x1] %vm69_vm11, %v68_v26  }
  0x8a   :  { %76 = vst.msk [vmem:[#allocation0] sm:$0x1] %vm75_vm12, %v74_v27  }
  0x8c   :  { %v80_v28 = vpop.permute.xlu0 %79   ;;  %v86_v29 = vpop.permute.xlu1 %85  }
  0x8d   :  { %82 = vst.msk [vmem:[#allocation0] sm:$0x1] %vm81_vm13, %v80_v28  }
  0x8e   :  { %88 = vst.msk [vmem:[#allocation0] sm:$0x1] %vm87_vm14, %v86_v29  }
  0x90   :  { %v92_v30 = vpop.permute.xlu0 %91  }
  0x91   :  { %94 = vst.msk [vmem:[#allocation0] sm:$0x1] %vm93_vm15, %v92_v30  }
  0x98   :  { %v98_v31 = vld [vmem:[#allocation0] sm:$0x1] }
  0x99   :  { %100 = vst [vmem:[%s208_s1] sm:$0x1] %v98_v31 }

// kernel: tile.34
= control target key start
LH: loop header
LB: loop body
LE: loop exit
PB: predicated region body
PF: predicated region fallthrough
CT: control target
= control target key end

     0   :  { %s131_s10 = smov 120   ;;  %s132_s11 = smov 104   ;;  %vm3_vm0 = vcmask 64512   ;;  %vm9_vm1 = vcmask 1048512   ;;  %vm15_vm2 = vcmask 982912   ;;  %vm21_vm3 = vcmask 917312   ;;  %s207_s0 = inlined_call_operand.vmem [shape: f32[16,8], index: 0, kind: input, shape index: {}]   ;;  %s208_s1 = inlined_call_operand.vmem [shape: f32[1,128], index: 1, kind: output, shape index: {}]  }
   0x1   :  { %v101_v0 = vld [vmem:[%s207_s0 + $0xf] sm:$0x1]   ;;  %v103_v1 = vld [vmem:[%s207_s0 + $0xd] sm:$0x1]   ;;  %v102_v2 = vld [vmem:[%s207_s0 + $0xe] sm:$0x1]  }
   0x2   :  { %7 = vrot.lane.b32.xlu0 %v101_v0, %s131_s10  ;;  %19 = vrot.lane.b32.xlu1 %v103_v1, %s132_s11  ;;  %v104_v3 = vld [vmem:[%s207_s0 + $0xc] sm:$0x1]   ;;  %s133_s16 = smov 112   ;;  %s134_s17 = smov 96   ;;  %v105_v4 = vld [vmem:[%s207_s0 + $0xb] sm:$0x1]  }
   0x3   :  { %v106_v5 = vld [vmem:[%s207_s0 + $0xa] sm:$0x1]   ;;  %v2_v6 = vld [vmem:[%s207_s0] sm:$0x1]   ;;  %s135_s24 = smov 88   ;;  %s136_s25 = smov 80  }
   0x4   :  { %4 = vst.msk [vmem:[#allocation0] sm:$0x1] %vm3_vm0, %v2_v6   ;;  %v107_v7 = vld [vmem:[%s207_s0 + $0x9] sm:$0x1]   ;;  %v108_v8 = vld [vmem:[%s207_s0 + $0x8] sm:$0x1]  }
   0x5   :  { %s137_s30 = smov 72   ;;  %s138_s2 = smov 64   ;;  %v109_v9 = vld [vmem:[%s207_s0 + $0x7] sm:$0x1]   ;;  %v110_v10 = vld [vmem:[%s207_s0 + $0x6] sm:$0x1]  }
   0x6   :  { %13 = vrot.lane.b32.xlu0 %v102_v2, %s133_s16  ;;  %25 = vrot.lane.b32.xlu1 %v104_v3, %s134_s17  ;;  %s139_s7 = smov 56   ;;  %s140_s8 = smov 48   ;;  %v111_v11 = vld [vmem:[%s207_s0 + $0x5] sm:$0x1]   ;;  %v112_v12 = vld [vmem:[%s207_s0 + $0x4] sm:$0x1]  }
   0x7   :  { %s141_s13 = smov 40   ;;  %s142_s14 = smov 32   ;;  %v113_v13 = vld [vmem:[%s207_s0 + $0x3] sm:$0x1]   ;;  %v114_v14 = vld [vmem:[%s207_s0 + $0x2] sm:$0x1]  }
   0x8   :  { %s143_s19 = smov 24   ;;  %s144_s20 = smov 16   ;;  %v115_v15 = vld [vmem:[%s207_s0 + $0x1] sm:$0x1]   ;;  %vm27_vm4 = vcmask 851712   ;;  %vm33_vm5 = vcmask 786112  }
   0x9   :  { %s145_s0 = smov 8   ;;  %vm39_vm6 = vcmask 720512   ;;  %vm45_vm7 = vcmask 654912   ;;  %vm51_vm8 = vcmask 589312   ;;  %vm57_vm9 = vcmask 523712  }
   0xa   :  { %31 = vrot.lane.b32.xlu0 %v105_v4, %s135_s24  ;;  %37 = vrot.lane.b32.xlu1 %v106_v5, %s136_s25  ;;  %vm63_vm10 = vcmask 458112   ;;  %vm69_vm11 = vcmask 392512   ;;  %vm75_vm12 = vcmask 326912   ;;  %vm81_vm13 = vcmask 261312  }
   0xb   :  { %vm87_vm14 = vcmask 195712   ;;  %vm93_vm15 = vcmask 130112  }
   0xe   :  { %43 = vrot.lane.b32.xlu0 %v107_v7, %s137_s30  ;;  %49 = vrot.lane.b32.xlu1 %v108_v8, %s138_s2 }
  0x12   :  { %55 = vrot.lane.b32.xlu0 %v109_v9, %s139_s7  ;;  %61 = vrot.lane.b32.xlu1 %v110_v10, %s140_s8 }
  0x16   :  { %67 = vrot.lane.b32.xlu0 %v111_v11, %s141_s13  ;;  %73 = vrot.lane.b32.xlu1 %v112_v12, %s142_s14 }
  0x1a   :  { %79 = vrot.lane.b32.xlu0 %v113_v13, %s143_s19  ;;  %85 = vrot.lane.b32.xlu1 %v114_v14, %s144_s20 }
  0x1e   :  { %91 = vrot.lane.b32.xlu0 %v115_v15, %s145_s0 }
  0x74   :  { %v8_v16 = vpop.permute.xlu0 %7   ;;  %v20_v17 = vpop.permute.xlu1 %19  }
  0x75   :  { %10 = vst.msk [vmem:[#allocation0] sm:$0x1] %vm9_vm1, %v8_v16  }
  0x78   :  { %v14_v18 = vpop.permute.xlu0 %13   ;;  %v26_v19 = vpop.permute.xlu1 %25  }
  0x79   :  { %16 = vst.msk [vmem:[#allocation0] sm:$0x1] %vm15_vm2, %v14_v18  }
  0x7a   :  { %22 = vst.msk [vmem:[#allocation0] sm:$0x1] %vm21_vm3, %v20_v17  }
  0x7b   :  { %28 = vst.msk [vmem:[#allocation0] sm:$0x1] %vm27_vm4, %v26_v19  }
  0x7c   :  { %v32_v20 = vpop.permute.xlu0 %31   ;;  %v38_v21 = vpop.permute.xlu1 %37  }
  0x7d   :  { %34 = vst.msk [vmem:[#allocation0] sm:$0x1] %vm33_vm5, %v32_v20  }
  0x7e   :  { %40 = vst.msk [vmem:[#allocation0] sm:$0x1] %vm39_vm6, %v38_v21  }
  0x80   :  { %v44_v22 = vpop.permute.xlu0 %43   ;;  %v50_v23 = vpop.permute.xlu1 %49  }
  0x81   :  { %46 = vst.msk [vmem:[#allocation0] sm:$0x1] %vm45_vm7, %v44_v22  }
  0x82   :  { %52 = vst.msk [vmem:[#allocation0] sm:$0x1] %vm51_vm8, %v50_v23  }
  0x84   :  { %v56_v24 = vpop.permute.xlu0 %55   ;;  %v62_v25 = vpop.permute.xlu1 %61  }
  0x85   :  { %58 = vst.msk [vmem:[#allocation0] sm:$0x1] %vm57_vm9, %v56_v24  }
  0x86   :  { %64 = vst.msk [vmem:[#allocation0] sm:$0x1] %vm63_vm10, %v62_v25  }
  0x88   :  { %v68_v26 = vpop.permute.xlu0 %67   ;;  %v74_v27 = vpop.permute.xlu1 %73  }
  0x89   :  { %70 = vst.msk [vmem:[#allocation0] sm:$0x1] %vm69_vm11, %v68_v26  }
  0x8a   :  { %76 = vst.msk [vmem:[#allocation0] sm:$0x1] %vm75_vm12, %v74_v27  }
  0x8c   :  { %v80_v28 = vpop.permute.xlu0 %79   ;;  %v86_v29 = vpop.permute.xlu1 %85  }
  0x8d   :  { %82 = vst.msk [vmem:[#allocation0] sm:$0x1] %vm81_vm13, %v80_v28  }
  0x8e   :  { %88 = vst.msk [vmem:[#allocation0] sm:$0x1] %vm87_vm14, %v86_v29  }
  0x90   :  { %v92_v30 = vpop.permute.xlu0 %91  }
  0x91   :  { %94 = vst.msk [vmem:[#allocation0] sm:$0x1] %vm93_vm15, %v92_v30  }
  0x98   :  { %v98_v31 = vld [vmem:[#allocation0] sm:$0x1] }
  0x99   :  { %100 = vst [vmem:[%s208_s1] sm:$0x1] %v98_v31 }

// kernel: basic_block2_forward.1
= control target key start
LH: loop header
LB: loop body
LE: loop exit
PB: predicated region body
PF: predicated region fallthrough
CT: control target
= control target key end

     0   :  { %s1330_s18 = smov 0   ;;  %s1561_s0 = inlined_call_operand.vmem [shape: f32[4,16,128], index: 0, kind: input, shape index: {}]   ;;  %s1562_s1 = inlined_call_operand.vmem [shape: bf16[384,128], index: 1, kind: input, shape index: {}]   ;;  %s1563_s2 = inlined_call_operand.vmem [shape: bf16[384,128], index: 2, kind: input, shape index: {}]   ;;  %s1564_s3 = inlined_call_operand.vmem [shape: f32[1,128], index: 3, kind: input, shape index: {}]   ;;  %s1565_s4 = inlined_call_operand.vmem [shape: f32[1,128], index: 4, kind: input, shape index: {}]   ;;  %s1566_s5 = inlined_call_operand.vmem [shape: f32[4,16,128], index: 5, kind: output, shape index: {}]  }
   0x1 LB: > { %s1014_s19 = sadd.s32 4294967295, %s1296_s18   ;;  %p1018_p0 = scmp.ge.s32.totalorder %s1296_s18, 1  ;;  %s1296_s18 = sphi %s1330_s18, %s15_s18  }
   0x2   : > { %p189_p1 = scmp.lt.s32.totalorder %s1296_s18, 3 }
   0x4   : > { %p190_p2 = pnand %p1018_p0, %p189_p1 }
   0x5   : > { %v1242_v0 = vld [vmem:[%s1562_s1 + $0x40] sm:$0xff] (!%p190_p2)   ;;  %v1298_v2 = vmov (!%p190_p2), 0.0   ;;  %v1245_v4 = vld [vmem:[%s1562_s1 + $0x48] sm:$0xff] (!%p190_p2)   ;;  %vm1299_vm0 = vmmov (!%p190_p2), 0   ;;  %v1248_v7 = vld [vmem:[%s1562_s1 + $0x50] sm:$0xff] (!%p190_p2)   ;;  %s1019_s9 = sshll.u32 (!%p190_p2), %s1014_s19, 1 }
   0x6   : > { %193 = sbr.rel (%p190_p2) target bundleno = 513 (0x201), region = 40  ;;  %v1243_v1 = vld [vmem:[%s1562_s1] sm:$0xff] (!%p190_p2)   ;;  %1176 = vmatprep.subr.bf16.mxu1 (!%p190_p2), %v1298_v2  ;;  %234 = vst [vmem:[#allocation2] sm:$0x1] (!%p190_p2), %v1298_v2  ;;  %235 = vst [vmem:[#allocation2 + $0x11] sm:$0x1] (!%p190_p2), %v1298_v2  ;;  %1086 = vmatprep.subr.bf16.mxu0 (!%p190_p2), %v1242_v0 }
   0x7   : > { %236 = vst [vmem:[#allocation2 + $0x12] sm:$0x1] (!%p190_p2), %v1298_v2  ;;  %237 = vst [vmem:[#allocation2 + $0x23] sm:$0x1] (!%p190_p2), %v1298_v2  ;;  %v1244_v3 = vld [vmem:[%s1562_s1 + $0x80] sm:$0xff] (!%p190_p2)   ;;  %1087 = vmatpush3.bf16.msra.mxu0 (!%p190_p2), %v1243_v1  ;;  %v1246_v5 = vld [vmem:[%s1562_s1 + $0x8] sm:$0xff] (!%p190_p2)   ;;  %1192 = vmatprep.mubr.msk.bf16.mxu1 (!%p190_p2), %vm1299_vm0, %v1298_v2 }
   0x8   : > { %1177 = vmatpush3.bf16.msra.mxu1 (!%p190_p2), %v1244_v3  ;;  %1088 = vmatprep.subr.bf16.mxu0 (!%p190_p2), %v1245_v4  ;;  %v1247_v6 = vld [vmem:[%s1562_s1 + $0x88] sm:$0xff] (!%p190_p2)   ;;  %v1249_v8 = vld [vmem:[%s1562_s1 + $0x10] sm:$0xff] (!%p190_p2)   ;;  %v1251_v10 = vld [vmem:[%s1562_s1 + $0x58] sm:$0xff] (!%p190_p2)   ;;  %p220_p3 = scmp.lt.s32.totalorder (!%p190_p2), %s1019_s9, 3  ;;  %vm939_vm1 = vcmask (!%p190_p2), 1041408  }
   0x9   : > { %1178 = vmatprep.subr.bf16.mxu1 (!%p190_p2), %v1298_v2  ;;  %v1250_v9 = vld [vmem:[%s1562_s1 + $0x90] sm:$0xff] (!%p190_p2)   ;;  %v1252_v11 = vld [vmem:[%s1562_s1 + $0x18] sm:$0xff] (!%p190_p2)   ;;  %v1254_v13 = vld [vmem:[%s1562_s1 + $0x60] sm:$0xff] (!%p190_p2)  }
   0xa   : > { %v1253_v12 = vld [vmem:[%s1562_s1 + $0x98] sm:$0xff] (!%p190_p2)   ;;  %v1255_v14 = vld [vmem:[%s1562_s1 + $0x20] sm:$0xff] (!%p190_p2)   ;;  %v1257_v16 = vld [vmem:[%s1562_s1 + $0x68] sm:$0xff] (!%p190_p2)  }
   0xb   : > { %1089 = vmatpush3.bf16.msra.mxu0 (!%p190_p2), %v1246_v5  ;;  %v1256_v15 = vld [vmem:[%s1562_s1 + $0xa0] sm:$0xff] (!%p190_p2)   ;;  %v1258_v17 = vld [vmem:[%s1562_s1 + $0x28] sm:$0xff] (!%p190_p2)   ;;  %v1260_v19 = vld [vmem:[%s1562_s1 + $0x70] sm:$0xff] (!%p190_p2)  }
   0xc   : > { %1179 = vmatpush3.bf16.msra.mxu1 (!%p190_p2), %v1247_v6  ;;  %1090 = vmatprep.subr.bf16.mxu0 (!%p190_p2), %v1248_v7  ;;  %v1259_v18 = vld [vmem:[%s1562_s1 + $0xa8] sm:$0xff] (!%p190_p2)   ;;  %v1261_v20 = vld [vmem:[%s1562_s1 + $0x30] sm:$0xff] (!%p190_p2)   ;;  %v1263_v24 = vld [vmem:[%s1562_s1 + $0x78] sm:$0xff] (!%p190_p2)  }
   0xd   : > { %1180 = vmatprep.subr.bf16.mxu1 %v1298_v2  ;;  %s1568_s9 = smov (!%p220_p3, %s1019_s9), 3  ;;  %v1262_v21 = vld [vmem:[%s1562_s1 + $0xb0] sm:$0xff]   ;;  %v1264_v28 = vld [vmem:[%s1562_s1 + $0x38] sm:$0xff]   ;;  %v1266_v30 = vld [vmem:[%s1563_s2 + $0x40] sm:$0xff]  }
   0xe   : > { %s1084_s29 = sshll.u32 %s1568_s9, 4  ;;  %v1265_v29 = vld [vmem:[%s1562_s1 + $0xb8] sm:$0xff]   ;;  %v1268_v31 = vld [vmem:[%s1563_s2] sm:$0xff]   ;;  %v1269_v42 = vld [vmem:[%s1563_s2 + $0x48] sm:$0xff]  }
   0xf   : > { %1091 = vmatpush3.bf16.msra.mxu0 %v1249_v8  ;;  %s224_s14 = scalar_lea.vmem %s1561_s0, %s1084_s29  ;;  %v1267_v38 = vld [vmem:[%s1563_s2 + $0x80] sm:$0xff]   ;;  %v1271_v48 = vld [vmem:[%s1563_s2 + $0x8] sm:$0xff]   ;;  %v1272_v49 = vld [vmem:[%s1563_s2 + $0x50] sm:$0xff]   ;;  %s1548_s13 = scalar_lea.vmem %s1566_s5, %s1084_s29 }
  0x10   : > { %1181 = vmatpush3.bf16.msra.mxu1 %v1250_v9  ;;  %1092 = vmatprep.subr.bf16.mxu0 %v1251_v10  ;;  %v1421_v22 = vld [vmem:[%s224_s14] sm:$0xff]  ;;  %v1423_v23 = vld [vmem:[%s224_s14 + $0x8] sm:$0xff]  ;;  %v1432_v26 = vld [vmem:[%s224_s14 + $0x10] sm:$0xff] }
  0x11   : > { %1182 = vmatprep.subr.bf16.mxu1 %v1298_v2  ;;  %240 = vst [vmem:[#allocation2 + $0x1] sm:$0xff] %v1421_v22  ;;  %241 = vst [vmem:[#allocation2 + $0x9] sm:$0xff] %v1423_v23  ;;  %v263_v25 = vpack.c.bf16 %v1423_v23, %v1421_v22  ;;  %v1435_v27 = vld [vmem:[%s224_s14 + $0x18] sm:$0xff]  ;;  %v1270_v50 = vld [vmem:[%s1563_s2 + $0x88] sm:$0xff]  }
  0x12   : > { %245 = vst [vmem:[#allocation2 + $0x13] sm:$0xff] %v1432_v26  ;;  %246 = vst [vmem:[#allocation2 + $0x1b] sm:$0xff] %v1435_v27  ;;  %v1273_v54 = vld [vmem:[%s1563_s2 + $0x90] sm:$0xff]   ;;  %v1275_v60 = vld [vmem:[%s1563_s2 + $0x58] sm:$0xff]  }
  0x13   : > { %1093 = vmatpush3.bf16.msra.mxu0 %v1252_v11  ;;  %502 = vmatprep.mubr.bf16.mxu0 %v263_v25  ;;  %v1274_v59 = vld [vmem:[%s1563_s2 + $0x10] sm:$0xff]   ;;  %v1276_v61 = vld [vmem:[%s1563_s2 + $0x98] sm:$0xff]   ;;  %v1278_v63 = vld [vmem:[%s1563_s2 + $0x60] sm:$0xff]  }
  0x14   : > { %1183 = vmatpush3.bf16.msra.mxu1 %v1253_v12  ;;  %1094 = vmatprep.subr.bf16.mxu0 %v1254_v13  ;;  %v1277_v62 = vld [vmem:[%s1563_s2 + $0x18] sm:$0xff]   ;;  %v1279_v0 = vld [vmem:[%s1563_s2 + $0xa0] sm:$0xff]   ;;  %v1281_v3 = vld [vmem:[%s1563_s2 + $0x68] sm:$0xff]  }
  0x15   : > { %1184 = vmatprep.subr.bf16.mxu1 %v1298_v2  ;;  %v1280_v1 = vld [vmem:[%s1563_s2 + $0x20] sm:$0xff]   ;;  %v1282_v4 = vld [vmem:[%s1563_s2 + $0xa8] sm:$0xff]   ;;  %v1284_v6 = vld [vmem:[%s1563_s2 + $0x70] sm:$0xff]  }
  0x16   : > { %v1283_v5 = vld [vmem:[%s1563_s2 + $0x28] sm:$0xff]   ;;  %v1285_v7 = vld [vmem:[%s1563_s2 + $0xb0] sm:$0xff]   ;;  %v1287_v9 = vld [vmem:[%s1563_s2 + $0x78] sm:$0xff]  }
  0x17   : > { %1095 = vmatpush3.bf16.msra.mxu0 %v1255_v14  ;;  %v1286_v8 = vld [vmem:[%s1563_s2 + $0x30] sm:$0xff]   ;;  %v1288_v10 = vld [vmem:[%s1563_s2 + $0xb8] sm:$0xff]   ;;  %v1027_v14 = vld [vmem:[%s1564_s3] ss:$0 sm:$0xff] }
  0x18   : > { %1185 = vmatpush3.bf16.msra.mxu1 %v1256_v15  ;;  %1096 = vmatprep.subr.bf16.mxu0 %v1257_v16  ;;  %v247_v32 = vld [vmem:[#allocation2] sm:$0xff]  ;;  %v248_v33 = vld [vmem:[#allocation2 + $0x8] sm:$0xff]  ;;  %v1289_v11 = vld [vmem:[%s1563_s2 + $0x38] sm:$0xff]  }
  0x19   : > { %1186 = vmatprep.subr.bf16.mxu1 %v1298_v2  ;;  %v257_v34 = vld [vmem:[#allocation2 + $0x2] sm:$0xff]  ;;  %v262_v35 = vpack.c.bf16 %v248_v33, %v247_v32  ;;  %v258_v36 = vld [vmem:[#allocation2 + $0xa] sm:$0xff]  ;;  %v255_v40 = vld [vmem:[#allocation2 + $0x19] sm:$0xff] }
  0x1a   : > { %v254_v37 = vld [vmem:[#allocation2 + $0x11] sm:$0xff]  ;;  %v264_v39 = vpack.c.bf16 %v258_v36, %v257_v34  ;;  %v260_v46 = vld [vmem:[#allocation2 + $0x1a] sm:$0xff]  ;;  %v261_v56 = vld [vmem:[#allocation2 + $0x22] sm:$0x3] }
  0x1b   : > { %1097 = vmatpush3.bf16.msra.mxu0 %v1258_v17  ;;  %v249_v41 = vld [vmem:[#allocation2 + $0x10] sm:$0xff]  ;;  %v266_v43 = vpack.c.bf16 %v255_v40, %v254_v37  ;;  %v250_v44 = vld [vmem:[#allocation2 + $0x18] sm:$0xff]  ;;  %v256_v47 = vld [vmem:[#allocation2 + $0x21] sm:$0x3]  ;;  %v270_v58 = vpack.c.bf16 %v261_v56, %v261_v56 }
  0x1c   : > { %1187 = vmatpush3.bf16.msra.mxu1 %v1259_v18  ;;  %1098 = vmatprep.subr.bf16.mxu0 %v1260_v19  ;;  %v259_v45 = vld [vmem:[#allocation2 + $0x12] sm:$0xff]  ;;  %v265_v51 = vpack.c.bf16 %v250_v44, %v249_v41  ;;  %v269_v53 = vpack.c.bf16 %v256_v47, %v256_v47  ;;  %v251_v55 = vld [vmem:[#allocation2 + $0x20] sm:$0x3] }
  0x1d   : > { %1188 = vmatprep.subr.bf16.mxu1 %v1298_v2  ;;  %v267_v52 = vpack.c.bf16 %v260_v46, %v259_v45  ;;  %v268_v57 = vpack.c.bf16 %v251_v55, %v251_v55 }
  0x1f   : > { %1099 = vmatpush3.bf16.msra.mxu0 %v1261_v20 }
  0x20   : > { %1189 = vmatpush3.bf16.msra.mxu1 %v1262_v21  ;;  %1100 = vmatprep.subr.bf16.mxu0 %v1263_v24 }
  0x21   : > { %1190 = vmatprep.subr.bf16.mxu1 %v1298_v2 }
  0x23   : > { %1101 = vmatpush3.bf16.msra.mxu0 %v1264_v28 }
  0x24   : > { %1191 = vmatpush3.bf16.msra.mxu1 %v1265_v29  ;;  %1131 = vmatprep.subr.bf16.mxu0 %v1266_v30 }
  0x25   : > { %1204 = vmatprep.subr.bf16.mxu1 %v1298_v2 }
  0x26   : > { %503 = vmatmul.mubr.bf16.vlgmr.msra.gmra.mrb[0].mxu0 %v262_v35 }
  0x27   : > { %1193 = vmatmul.mubr.bf16.vlgmr.msra.gmra.mrb[0].mxu1 %v264_v39  ;;  %1132 = vmatpush3.bf16.msra.mxu0 %v1268_v31 }
  0x28   : > { %510 = vmatprep.mubr.bf16.mxu0 %v266_v43  ;;  %1196 = vmatprep.mubr.msk.bf16.mxu1 %vm1299_vm0, %v1298_v2 }
  0x29   : > { %1205 = vmatpush3.bf16.msra.mxu1 %v1267_v38  ;;  %1133 = vmatprep.subr.bf16.mxu0 %v1269_v42 }
  0x2a   : > { %1206 = vmatprep.subr.bf16.mxu1 %v1298_v2 }
  0x2b   : > { %1134 = vmatpush3.bf16.msra.mxu0 %v1271_v48 }
  0x2c   : > { %1135 = vmatprep.subr.bf16.mxu0 %v1272_v49 }
  0x2d   : > { %1207 = vmatpush3.bf16.msra.mxu1 %v1270_v50 }
  0x2e   : > { %511 = vmatmul.mubr.bf16.gmra.mrb[4].mxu0 %v265_v51  ;;  %1208 = vmatprep.subr.bf16.mxu1 %v1298_v2 }
  0x2f   : > { %1197 = vmatmul.mubr.bf16.gmra.mrb[4].mxu1 %v267_v52  ;;  %518 = vmatprep.mubr.bf16.mxu0 %v269_v53 }
  0x30   : > { %1200 = vmatprep.mubr.msk.bf16.mxu1 %vm1299_vm0, %v1298_v2  ;;  %1136 = vmatpush3.bf16.msra.mxu0 %v1274_v59 }
  0x31   : > { %1209 = vmatpush3.bf16.msra.mxu1 %v1273_v54  ;;  %1137 = vmatprep.subr.bf16.mxu0 %v1275_v60 }
  0x32   : > { %1210 = vmatprep.subr.bf16.mxu1 %v1298_v2 }
  0x34   : > { %1138 = vmatpush3.bf16.msra.mxu0 %v1277_v62 }
  0x35   : > { %1211 = vmatpush3.bf16.msra.mxu1 %v1276_v61  ;;  %1139 = vmatprep.subr.bf16.mxu0 %v1278_v63 }
  0x36   : > { %519 = vmatmul.mubr.bf16.gmra.mrb[8].mxu0 %v268_v57  ;;  %1212 = vmatprep.subr.bf16.mxu1 %v1298_v2 }
  0x37   : > { %1201 = vmatmul.mubr.bf16.gmra.mrb[8].mxu1 %v270_v58 }
  0x38   : > { %1220 = vmatprep.mubr.msk.bf16.mxu1 %vm1299_vm0, %v1298_v2  ;;  %1140 = vmatpush3.bf16.msra.mxu0 %v1280_v1 }
  0x39   : > { %1213 = vmatpush3.bf16.msra.mxu1 %v1279_v0  ;;  %1141 = vmatprep.subr.bf16.mxu0 %v1281_v3 }
  0x3a   : > { %1214 = vmatprep.subr.bf16.mxu1 %v1298_v2 }
  0x3c   : > { %1142 = vmatpush3.bf16.msra.mxu0 %v1283_v5 }
  0x3d   : > { %1215 = vmatpush3.bf16.msra.mxu1 %v1282_v4  ;;  %1143 = vmatprep.subr.bf16.mxu0 %v1284_v6 }
  0x3e   : > { %1216 = vmatprep.subr.bf16.mxu1 %v1298_v2 }
  0x40   : > { %1144 = vmatpush3.bf16.msra.mxu0 %v1286_v8 }
  0x41   : > { %1217 = vmatpush3.bf16.msra.mxu1 %v1285_v7  ;;  %1145 = vmatprep.subr.bf16.mxu0 %v1287_v9 }
  0x42   : > { %1218 = vmatprep.subr.bf16.mxu1 %v1298_v2 }
  0x44   : > { %1146 = vmatpush3.bf16.msra.mxu0 %v1289_v11 }
  0x45   : > { %1219 = vmatpush3.bf16.msra.mxu1 %v1288_v10 }
  0xf9   : > { %v1102_v12 = vpop.f32.mrb[0].mxu0 }
  0xfa   : > { %v1103_v13 = vpop.f32.mrb[1].mxu0  ;;  %v560_v15 = vpop.f32.mrb[0].mxu1 }
  0xfb   : > { %v1104_v16 = vadd.f32 %v1103_v13, %v1102_v12  ;;  %v1105_v17 = vpop.f32.mrb[2].mxu0  ;;  %v1194_v18 = vpop.f32.mrb[1].mxu1 }
  0xfc   : > { %v1106_v19 = vpop.f32.mrb[3].mxu0  ;;  %v563_v20 = vpop.f32.mrb[2].mxu1 }
  0xfd   : > { %v505_v21 = vadd.f32 %v1104_v16, %v1027_v14  ;;  %v1107_v24 = vadd.f32 %v1106_v19, %v1105_v17  ;;  %v1195_v25 = vpop.f32.mrb[3].mxu1 }
  0xff   : > { %v561_v28 = vadd.f32 %v560_v15, %v505_v21  ;;  %v508_v29 = vadd.f32 %v1107_v24, %v1027_v14  ;;  %v1052_v24 = vld [vmem:[%s1565_s4] ss:$0 sm:$0xff] }
 0x101   : > { %v582_v30 = vmax.f32 %v561_v28, 0.0  ;;  %v564_v31 = vadd.f32 %v563_v20, %v508_v29  ;;  %v1108_v32 = vpop.f32.mrb[4].mxu0 }
 0x102   : > { %v1109_v33 = vpop.f32.mrb[5].mxu0  ;;  %v568_v34 = vpop.f32.mrb[4].mxu1 }
 0x103   : > { %587 = vst [vmem:[#allocation2 + $0x1] sm:$0xff] %v582_v30  ;;  %v583_v35 = vmax.f32 %v564_v31, 0.0  ;;  %v1110_v36 = vadd.f32 %v1109_v33, %v1108_v32  ;;  %v1111_v37 = vpop.f32.mrb[6].mxu0  ;;  %v1198_v38 = vpop.f32.mrb[5].mxu1 }
 0x104   : > { %v1112_v39 = vpop.f32.mrb[7].mxu0  ;;  %v571_v40 = vpop.f32.mrb[6].mxu1 }
 0x105   : > { %588 = vst [vmem:[#allocation2 + $0x9] sm:$0xff] %v583_v35  ;;  %v513_v41 = vadd.f32 %v1110_v36, %v1027_v14  ;;  %v1113_v42 = vadd.f32 %v1112_v39, %v1111_v37  ;;  %v1199_v43 = vpop.f32.mrb[7].mxu1  ;;  %v608_v44 = vpack.c.bf16 %v583_v35, %v582_v30 }
 0x107   : > { %v569_v45 = vadd.f32 %v568_v34, %v513_v41  ;;  %v516_v46 = vadd.f32 %v1113_v42, %v1027_v14  ;;  %847 = vmatprep.mubr.bf16.mxu0 %v608_v44 }
 0x109   : > { %v584_v47 = vmax.f32 %v569_v45, 0.0  ;;  %v572_v48 = vadd.f32 %v571_v40, %v516_v46  ;;  %v1114_v49 = vpop.f32.mrb[8].mxu0  ;;  %v940_v45 = vrot.slane %v1432_v26, 6 }
 0x10a   : > { %v1115_v50 = vpop.f32.mrb[9].mxu0  ;;  %v576_v51 = vpop.f32.mrb[8].mxu1  ;;  %v592_v56 = vld [vmem:[#allocation2] sm:$0xff] }
 0x10b   : > { %589 = vst [vmem:[#allocation2 + $0x11] sm:$0xfc] %v584_v47  ;;  %v585_v52 = vmax.f32 %v572_v48, 0.0  ;;  %v1116_v53 = vadd.f32 %v1115_v50, %v1114_v49  ;;  %v1117_v54 = vpop.f32.mrb[10].mxu0  ;;  %v1202_v55 = vpop.f32.mrb[9].mxu1  ;;  %v941_v48 = vrot.slane %v1435_v27, 6 }
 0x10c   : > { %v1118_v57 = vpop.f32.mrb[11].mxu0  ;;  %v579_v58 = vpop.f32.mrb[10].mxu1  ;;  %v602_v59 = vld [vmem:[#allocation2 + $0x2] sm:$0xff]  ;;  %v603_v60 = vld [vmem:[#allocation2 + $0xa] sm:$0xff] }
 0x10d   : > { %v593_v61 = vld [vmem:[#allocation2 + $0x8] sm:$0xff]  ;;  %590 = vst [vmem:[#allocation2 + $0x19] sm:$0xff] %v585_v52  ;;  %v521_v62 = vadd.f32 %v1116_v53, %v1027_v14  ;;  %v1203_v63 = vpop.f32.mrb[11].mxu1  ;;  %v609_v0 = vpack.c.bf16 %v603_v60, %v602_v59 }
 0x10e   : > { %v607_v1 = vpack.c.bf16 %v593_v61, %v592_v56 }
 0x10f   : > { %v577_v3 = vadd.f32 %v576_v51, %v521_v62  ;;  %1221 = vmatmul.mubr.bf16.vlgmr.msra.gmra.mrb[12].mxu1 %v609_v0 }
 0x110   : > { %848 = vmatmul.mubr.bf16.vlgmr.msra.gmra.mrb[12].mxu0 %v607_v1  ;;  %1224 = vmatprep.mubr.msk.bf16.mxu1 %vm1299_vm0, %v1298_v2 }
 0x111   : > { %v586_v4 = vmax.f32 %v577_v3, 0.0 }
 0x112   : > { %v599_v5 = vld [vmem:[#allocation2 + $0x11] sm:$0xff] }
 0x113   : > { %591 = vst [vmem:[#allocation2 + $0x21] sm:$0x3] %v586_v4  ;;  %v611_v6 = vpack.c.bf16 %v585_v52, %v599_v5  ;;  %v594_v7 = vld [vmem:[#allocation2 + $0x10] sm:$0xff] }
 0x114   : > { %v595_v8 = vld [vmem:[#allocation2 + $0x18] sm:$0xff] }
 0x115   : > { %855 = vmatprep.mubr.bf16.mxu0 %v611_v6  ;;  %v610_v9 = vpack.c.bf16 %v595_v8, %v594_v7  ;;  %v604_v10 = vld [vmem:[#allocation2 + $0x12] sm:$0xff] }
 0x118   : > { %856 = vmatmul.mubr.bf16.gmra.mrb[16].mxu0 %v610_v9 }
 0x11a   : > { %v601_v11 = vld [vmem:[#allocation2 + $0x21] sm:$0x3] }
 0x11b   : > { %v605_v12 = vld [vmem:[#allocation2 + $0x1a] sm:$0xff]  ;;  %v614_v14 = vpack.c.bf16 %v601_v11, %v601_v11  ;;  %v606_v17 = vld [vmem:[#allocation2 + $0x22] sm:$0x3] }
 0x11c   : > { %v596_v13 = vld [vmem:[#allocation2 + $0x20] sm:$0x3]  ;;  %v612_v15 = vpack.c.bf16 %v605_v12, %v604_v10  ;;  %v615_v18 = vpack.c.bf16 %v606_v17, %v606_v17 }
 0x11d   : > { %863 = vmatprep.mubr.bf16.mxu0 %v614_v14  ;;  %v613_v16 = vpack.c.bf16 %v596_v13, %v596_v13 }
 0x11e   : > { %1225 = vmatmul.mubr.bf16.gmra.mrb[16].mxu1 %v612_v15 }
 0x11f   : > { %1228 = vmatprep.mubr.msk.bf16.mxu1 %vm1299_vm0, %v1298_v2 }
 0x120   : > { %864 = vmatmul.mubr.bf16.gmra.mrb[20].mxu0 %v613_v16 }
 0x126   : > { %1229 = vmatmul.mubr.bf16.gmra.mrb[20].mxu1 %v615_v18 }
 0x1e2   : > { %v905_v19 = vpop.f32.mrb[12].mxu1 }
 0x1e3   : > { %v1147_v20 = vpop.f32.mrb[12].mxu0  ;;  %v1222_v21 = vpop.f32.mrb[13].mxu1 }
 0x1e4   : > { %v1148_v25 = vpop.f32.mrb[13].mxu0  ;;  %v908_v29 = vpop.f32.mrb[14].mxu1 }
 0x1e5   : > { %v1149_v28 = vadd.f32 %v1148_v25, %v1147_v20  ;;  %v1150_v30 = vpop.f32.mrb[14].mxu0  ;;  %v1223_v31 = vpop.f32.mrb[15].mxu1 }
 0x1e6   : > { %v1151_v32 = vpop.f32.mrb[15].mxu0 }
 0x1e7   : > { %v850_v33 = vadd.f32 %v1149_v28, %v1052_v24  ;;  %v1152_v2 = vadd.f32 %v1151_v32, %v1150_v30 }
 0x1e9   : > { %v906_v34 = vadd.f32 %v905_v19, %v850_v33  ;;  %v853_v35 = vadd.f32 %v1152_v2, %v1052_v24 }
 0x1eb   : > { %v929_v36 = vadd.f32 %v906_v34, %v1421_v22  ;;  %v909_v37 = vadd.f32 %v908_v29, %v853_v35  ;;  %v1153_v38 = vpop.f32.mrb[16].mxu0 }
 0x1ec   : > { %v1154_v39 = vpop.f32.mrb[17].mxu0 }
 0x1ed   : > { %v931_v40 = vmax.f32 %v929_v36, 0.0  ;;  %v930_v41 = vadd.f32 %v909_v37, %v1423_v23  ;;  %v1155_v42 = vadd.f32 %v1154_v39, %v1153_v38  ;;  %v1156_v43 = vpop.f32.mrb[18].mxu0  ;;  %v942_v23 = vsel %vm939_vm1, %v940_v45, %v941_v48 }
 0x1ee   : > { %v1157_v44 = vpop.f32.mrb[19].mxu0 }
 0x1ef   : > { %933 = vst [vmem:[%s1548_s13] sm:$0xff] %v931_v40  ;;  %v932_v22 = vmax.f32 %v930_v41, 0.0  ;;  %v1158_v46 = vadd.f32 %v1157_v44, %v1156_v43  ;;  %v858_v47 = vadd.f32 %v1155_v42, %v1052_v24 }
 0x1f1   : > { %934 = vst [vmem:[%s1548_s13 + $0x8] sm:$0xff] %v932_v22  ;;  %v913_v49 = vpop.f32.mrb[16].mxu1  ;;  %v861_v50 = vadd.f32 %v1158_v46, %v1052_v24 }
 0x1f2   : > { %v914_v51 = vadd.f32 %v913_v49, %v858_v47  ;;  %v1226_v52 = vpop.f32.mrb[17].mxu1 }
 0x1f3   : > { %v916_v53 = vpop.f32.mrb[18].mxu1  ;;  %v1159_v54 = vpop.f32.mrb[20].mxu0 }
 0x1f4   : > { %v946_v55 = vadd.f32 %v940_v45, %v914_v51  ;;  %v917_v56 = vadd.f32 %v916_v53, %v861_v50  ;;  %v1227_v26 = vpop.f32.mrb[19].mxu1  ;;  %v1160_v57 = vpop.f32.mrb[21].mxu0 }
 0x1f5   : > { %v1161_v58 = vadd.f32 %v1160_v57, %v1159_v54  ;;  %v1162_v59 = vpop.f32.mrb[22].mxu0 }
 0x1f6   : > { %v949_v60 = vmax.f32 %v946_v55, 0.0  ;;  %v947_v27 = vadd.f32 %v942_v23, %v917_v56  ;;  %v1163_v61 = vpop.f32.mrb[23].mxu0 }
 0x1f7   : > { %v866_v62 = vadd.f32 %v1161_v58, %v1052_v24 }
 0x1f8   : > { %1079 = vst [vmem:[%s1548_s13 + $0xe] sm:$0xfc] %v949_v60  ;;  %v950_v63 = vmax.f32 %v947_v27, 0.0 }
 0x1f9   : > { %v921_v0 = vpop.f32.mrb[20].mxu1 }
 0x1fa   : > { %1080 = vst [vmem:[%s1548_s13 + $0x16] sm:$0xff] %v950_v63  ;;  %v922_v1 = vadd.f32 %v921_v0, %v866_v62  ;;  %v1230_v3 = vpop.f32.mrb[21].mxu1 }
 0x1fb   : > { %v924_v4 = vpop.f32.mrb[22].mxu1 }
 0x1fc   : > { %v948_v5 = vadd.f32 %v941_v48, %v922_v1  ;;  %v1231_v6 = vpop.f32.mrb[23].mxu1 }
 0x1fe   : > { %v951_v7 = vmax.f32 %v948_v5, 0.0 }
 0x200   : > { %1081 = vst [vmem:[%s1548_s13 + $0x1e] sm:$0x3] %v951_v7 }
 0x201 PF: > { %s15_s18 = sadd.s32 1, %s1296_s18  }
 0x202   : > { %p12_p4 = scmp.ge.s32.totalorder %s15_s18, 4  }
 0x204   :  { %14 = sbr.rel (!%p12_p4) target bundleno = 1 (0x1), region = 72 }

</bundles_post_ra>
